<compile_context>
chip_gen: v7x
topology: tpu7x:2x2x1
jax: 0.10.0
libtpu: 0.0.40
codegen_flags: <defaults>
</compile_context>

<pallas_src>
import functools

import jax
import jax.numpy as jnp
from jax.experimental import pallas as pl
from jax.experimental.pallas import tpu as pltpu

LANE = 128
SUBLANE = 8
_DEFAULT_BLOCK_BYTES = 4 * 1024 * 1024  # ~4 MiB x-blocks (good on v5e/v6e/v7x)


def _round_up(x, m):
    return (x + m - 1) // m * m


def _layernorm_kernel(x_ref, gamma_ref, beta_ref, o_ref, *, eps, inv_c):
    # x_ref: (Nb, C, L) slab of the (N, C, H*W) buffer. Each lane-column is
    # normalized over the C (sublane) axis; columns are fully independent, so
    # ragged/OOB lanes or rows (masked on store) never affect valid columns.
    x = x_ref[...].astype(jnp.float32)

    # One sweep over the block: sum(x) and sum(x*x) -> mean / biased variance.
    s = jnp.sum(x, axis=1, keepdims=True)
    sq = jnp.sum(x * x, axis=1, keepdims=True)
    mean = s * inv_c
    var = jnp.maximum(sq * inv_c - mean * mean, 0.0)   # clamp fp cancellation
    inv = jax.lax.rsqrt(var + eps)                     # (Nb, 1, L), EUP

    scale = inv * gamma_ref[...].astype(jnp.float32)               # (Nb, C, L)
    shift = beta_ref[...].astype(jnp.float32) - mean * scale       # (Nb, C, L)
    o_ref[...] = (x * scale + shift).astype(o_ref.dtype)


def my_layer_norm(x_nchw, gamma, beta, *, eps=1e-6,
                  target_block_bytes=_DEFAULT_BLOCK_BYTES):
    """Equivalent of PyTorch myLayerNorm.forward on an NCHW input."""
    N, C, H, W = x_nchw.shape
    HW = H * W
    itemsize = jnp.dtype(x_nchw.dtype).itemsize

    # Pure reshape of the contiguous NCHW buffer (no transpose, no pad).
    x3 = x_nchw.reshape(N, C, HW)
    gamma3 = gamma.reshape(1, C, 1)
    beta3 = beta.reshape(1, C, 1)

    # ---- Block sizing -------------------------------------------------------
    # Lanes per block under the byte target: multiple of 128, at least 128.
    tl = max(LANE, target_block_bytes // max(1, C * itemsize) // LANE * LANE)

    if tl < HW:
        # Large feature maps: tile the H*W (lane) axis, one image per block.
        nb = 1
        lane_block = tl
        grid = (N, pl.cdiv(HW, tl))                       # ragged last block OK
        x_spec = pl.BlockSpec((1, C, tl), lambda n, l: (n, 0, l))
        gb_spec = pl.BlockSpec((1, C, 1), lambda n, l: (0, 0, 0))
        out_spec = pl.BlockSpec((1, C, tl), lambda n, l: (n, 0, l))
        dims = ("parallel", "parallel")
    else:
        # Small feature maps: full H*W per block; batch images so each grid step
        # still moves ~target bytes (amortizes the ~0.35 us per-step overhead).
        per_image = max(1, C * _round_up(HW, LANE) * itemsize)
        nb = max(1, min(N, target_block_bytes // per_image))
        lane_block = HW
        grid = (pl.cdiv(N, nb),)                          # ragged last block OK
        x_spec = pl.BlockSpec((nb, C, HW), lambda n: (n, 0, 0))
        gb_spec = pl.BlockSpec((1, C, 1), lambda n: (0, 0, 0))
        out_spec = pl.BlockSpec((nb, C, HW), lambda n: (n, 0, 0))
        dims = ("parallel",)

    # ---- VMEM budget from the actual block footprint ------------------------
    block_elems = nb * _round_up(C, SUBLANE) * _round_up(lane_block, LANE)
    io_bytes = 4 * block_elems * itemsize     # double-buffered input + output
    tmp_bytes = 3 * block_elems * 4           # f32 temps inside the kernel
    vmem_limit = int(min(56 * 2**20,
                         max(32 * 2**20, (io_bytes + tmp_bytes) * 3 // 2)))

    kernel = functools.partial(_layernorm_kernel, eps=eps, inv_c=1.0 / C)
    y3 = pl.pallas_call(
        kernel,
        out_shape=jax.ShapeDtypeStruct((N, C, HW), x_nchw.dtype),
        grid_spec=pltpu.PrefetchScalarGridSpec(
            num_scalar_prefetch=0,
            grid=grid,
            in_specs=[x_spec, gb_spec, gb_spec],
            out_specs=out_spec,
        ),
        compiler_params=pltpu.CompilerParams(
            # Both/all axes independent; on v7x this lets the grid shard across
            # the 2 TensorCores.  (If profiling ever shows one TC idle, switch
            # the dominant axis to pltpu.CORE_PARALLEL.)
            dimension_semantics=dims,
            vmem_limit_bytes=vmem_limit,
        ),
    )(x3, gamma3, beta3)

    return y3.reshape(N, C, H, W)


def _reference(x_nchw, gamma, beta, eps=1e-6):
    x = jnp.transpose(x_nchw, (0, 2, 3, 1)).astype(jnp.float32)
    mean = jnp.mean(x, axis=-1, keepdims=True)
    var = jnp.mean((x - mean) ** 2, axis=-1, keepdims=True)
    y = (x - mean) / jnp.sqrt(var + eps) * gamma + beta
    return jnp.transpose(y, (0, 3, 1, 2)).astype(x_nchw.dtype)


if __name__ == "__main__":
    key = jax.random.PRNGKey(0)
    kx, kg, kb = jax.random.split(key, 3)

    # Primary case (module at small shapes): image-batched path.
    N, C, H, W = 2, 4, 16, 16
    x = jax.random.normal(kx, (N, C, H, W), dtype=jnp.float32)
    gamma = jnp.ones((C,), dtype=jnp.float32)   # nn.LayerNorm default init
    beta = jnp.zeros((C,), dtype=jnp.float32)

    out = jax.block_until_ready(my_layer_norm(x, gamma, beta, eps=1e-6))
    ref = _reference(x, gamma, beta, eps=1e-6)
    assert out.shape == (N, C, H, W)
    assert jnp.allclose(out, ref, atol=3e-5, rtol=1e-5)

    # Ragged lane-tiled path (H*W not a multiple of the lane tile) with
    # nontrivial gamma/beta; forces grid=(N, cdiv(HW, tl)) + masked last block.
    N2, C2, H2, W2 = 2, 4, 15, 15
    x2 = jax.random.normal(kx, (N2, C2, H2, W2), dtype=jnp.float32)
    gamma2 = jax.random.normal(kg, (C2,), dtype=jnp.float32)
    beta2 = jax.random.normal(kb, (C2,), dtype=jnp.float32)
    out2 = jax.block_until_ready(
        my_layer_norm(x2, gamma2, beta2, eps=1e-6, target_block_bytes=2048))
    assert jnp.allclose(out2, _reference(x2, gamma2, beta2, eps=1e-6),
                        atol=3e-5, rtol=1e-5)

    # Ragged image-batched path (N not a multiple of images-per-block).
    N3 = 3
    x3 = jax.random.normal(kx, (N3, C, H, W), dtype=jnp.float32)
    out3 = jax.block_until_ready(
        my_layer_norm(x3, gamma2, beta2, eps=1e-6, target_block_bytes=8192))
    assert jnp.allclose(out3, _reference(x3, gamma2, beta2, eps=1e-6),
                        atol=3e-5, rtol=1e-5)

    print("KERNEL_OK")
</pallas_src>

<mosaic_0001>
module attributes {stable_mosaic.version = 11 : i64} {
  func.func @_layernorm_kernel(%arg0: i32, %arg1: memref<2x4x256xf32, #tpu.memory_space<vmem>>, %arg2: memref<1x4x1xf32, #tpu.memory_space<vmem>>, %arg3: memref<1x4x1xf32, #tpu.memory_space<vmem>>, %arg4: memref<2x4x256xf32, #tpu.memory_space<vmem>>) attributes {dimension_semantics = [#tpu.dimension_semantics<parallel>], iteration_bounds = array<i64: 1>, scalar_prefetch = 0 : i64, scratch_operands = 0 : i64, tpu.core_type = #tpu.core_type<tc>, window_params = [{transform_indices = @transform_0, window_bounds = array<i64: 2, 4, 256>}, {pipeline_mode = #tpu.pipeline_mode<synchronous>, transform_indices = @transform_1, window_bounds = array<i64: 1, 4, 1>}, {pipeline_mode = #tpu.pipeline_mode<synchronous>, transform_indices = @transform_2, window_bounds = array<i64: 1, 4, 1>}, {transform_indices = @transform_3, window_bounds = array<i64: 2, 4, 256>}]} {
    %c0 = arith.constant 0 : index
    %c0_0 = arith.constant 0 : index
    %c0_1 = arith.constant 0 : index
    %0 = vector.load %arg1[%c0, %c0_0, %c0_1] : memref<2x4x256xf32, #tpu.memory_space<vmem>>, vector<2x4x256xf32>
    %cst = arith.constant dense<0.000000e+00> : vector<2x256xf32>
    %1 = vector.multi_reduction <add>, %0, %cst [1] : vector<2x4x256xf32> to vector<2x256xf32>
    %2 = vector.shape_cast %1 : vector<2x256xf32> to vector<2x1x256xf32>
    %3 = arith.mulf %0, %0 : vector<2x4x256xf32>
    %cst_2 = arith.constant dense<0.000000e+00> : vector<2x256xf32>
    %4 = vector.multi_reduction <add>, %3, %cst_2 [1] : vector<2x4x256xf32> to vector<2x256xf32>
    %5 = vector.shape_cast %4 : vector<2x256xf32> to vector<2x1x256xf32>
    %cst_3 = arith.constant 2.500000e-01 : f32
    %6 = vector.broadcast %cst_3 : f32 to vector<2x1x256xf32>
    %7 = arith.mulf %2, %6 : vector<2x1x256xf32>
    %cst_4 = arith.constant 2.500000e-01 : f32
    %8 = vector.broadcast %cst_4 : f32 to vector<2x1x256xf32>
    %9 = arith.mulf %5, %8 : vector<2x1x256xf32>
    %10 = arith.mulf %7, %7 : vector<2x1x256xf32>
    %11 = arith.subf %9, %10 : vector<2x1x256xf32>
    %cst_5 = arith.constant 0.000000e+00 : f32
    %12 = vector.broadcast %cst_5 : f32 to vector<2x1x256xf32>
    %13 = arith.maximumf %11, %12 : vector<2x1x256xf32>
    %cst_6 = arith.constant 9.99999997E-7 : f32
    %14 = vector.broadcast %cst_6 : f32 to vector<2x1x256xf32>
    %15 = arith.addf %13, %14 : vector<2x1x256xf32>
    %16 = math.rsqrt %15 : vector<2x1x256xf32>
    %c0_7 = arith.constant 0 : index
    %c0_8 = arith.constant 0 : index
    %c0_9 = arith.constant 0 : index
    %17 = vector.load %arg2[%c0_7, %c0_8, %c0_9] : memref<1x4x1xf32, #tpu.memory_space<vmem>>, vector<1x4x1xf32>
    %18 = vector.broadcast %16 : vector<2x1x256xf32> to vector<2x4x256xf32>
    %19 = vector.broadcast %17 : vector<1x4x1xf32> to vector<2x4x256xf32>
    %20 = arith.mulf %18, %19 : vector<2x4x256xf32>
    %c0_10 = arith.constant 0 : index
    %c0_11 = arith.constant 0 : index
    %c0_12 = arith.constant 0 : index
    %21 = vector.load %arg3[%c0_10, %c0_11, %c0_12] : memref<1x4x1xf32, #tpu.memory_space<vmem>>, vector<1x4x1xf32>
    %22 = vector.broadcast %7 : vector<2x1x256xf32> to vector<2x4x256xf32>
    %23 = arith.mulf %22, %20 : vector<2x4x256xf32>
    %24 = vector.broadcast %21 : vector<1x4x1xf32> to vector<2x4x256xf32>
    %25 = arith.subf %24, %23 : vector<2x4x256xf32>
    %26 = arith.mulf %0, %20 : vector<2x4x256xf32>
    %27 = arith.addf %26, %25 : vector<2x4x256xf32>
    %c0_13 = arith.constant 0 : index
    %c0_14 = arith.constant 0 : index
    %c0_15 = arith.constant 0 : index
    %28 = vector.load %arg4[%c0_13, %c0_14, %c0_15] : memref<2x4x256xf32, #tpu.memory_space<vmem>>, vector<2x4x256xf32>
    tpu.vector_store %arg4[%c0_13, %c0_14, %c0_15], %27 {strides = array<i32>} : memref<2x4x256xf32, #tpu.memory_space<vmem>>, vector<2x4x256xf32>,
    return
  }
  func.func @transform_0(%arg0: i32) -> (i32, i32, i32) {
    %c0_i32 = arith.constant 0 : i32
    %c0_i32_0 = arith.constant 0 : i32
    %c0_i32_1 = arith.constant 0 : i32
    return %arg0, %c0_i32, %c0_i32_0 : i32, i32, i32
  }
  func.func @transform_1(%arg0: i32) -> (i32, i32, i32) {
    %c0_i32 = arith.constant 0 : i32
    %c0_i32_0 = arith.constant 0 : i32
    %c0_i32_1 = arith.constant 0 : i32
    %c0_i32_2 = arith.constant 0 : i32
    return %c0_i32, %c0_i32_0, %c0_i32_1 : i32, i32, i32
  }
  func.func @transform_2(%arg0: i32) -> (i32, i32, i32) {
    %c0_i32 = arith.constant 0 : i32
    %c0_i32_0 = arith.constant 0 : i32
    %c0_i32_1 = arith.constant 0 : i32
    %c0_i32_2 = arith.constant 0 : i32
    return %c0_i32, %c0_i32_0, %c0_i32_1 : i32, i32, i32
  }
  func.func @transform_3(%arg0: i32) -> (i32, i32, i32) {
    %c0_i32 = arith.constant 0 : i32
    %c0_i32_0 = arith.constant 0 : i32
    %c0_i32_1 = arith.constant 0 : i32
    return %arg0, %c0_i32, %c0_i32_0 : i32, i32, i32
  }
}

</mosaic_0001>

<bundles_post_ra>
// kernel: tpu_custom_call.1
= control target key start
LH: loop header
LB: loop body
LE: loop exit
PB: predicated region body
PF: predicated region fallthrough
CT: control target
= control target key end

     0   :  { %8 = vsyncpa [#allocation3], 0  ;;  %s342_s0 = inlined_call_operand.hbm [shape: f32[2,4,256], index: 0, kind: input, shape index: {}]   ;;  %s343_s1 = inlined_call_operand.vmem [shape: f32[1,4,1], index: 1, kind: input, shape index: {}]   ;;  %s344_s2 = inlined_call_operand.vmem [shape: f32[1,4,1], index: 2, kind: input, shape index: {}]   ;;  %s345_s3 = inlined_call_operand.hbm [shape: f32[2,4,256], index: 3, kind: output, shape index: {}]  }
   0x1   :  { %9 = vsyncpa [#allocation4], 0  ;;  %s257_s12 = smov [#allocation2]   ;;  %s209_s16 = scalar_lea.hbm %s342_s0, 256 }
   0x2   :  { %s15_s13 = sshll.u32 %s257_s12, 4  ;;  %p210_p0 = scmp.ne.s32.totalorder %s342_s0, %s209_s16  ;;  %s16_s13 = int_to_ptr.vmem [resolvable:$true] %s15_s13 }
   0x3   :  { %p213_p1 = scmp.lt.u32.totalorder %s209_s16, %s342_s0 }
   0x5   :  { %p215_p2 = pnand %p213_p1, %p210_p0 }
   0x7   :  { %218 = shalt.err (!%p215_p2)
}
   0x8   :  { %s219_s21 = scalar_lea.vmem %s16_s13, 256  ;;  %p224_p4 = scmp.lt.s32.totalorder %s16_s13, %s16_s13 }
   0x9   :  { %p220_p3 = scmp.ne.s32.totalorder %s16_s13, %s219_s21  ;;  %p225_p5 = scmp.lt.s32.totalorder %s219_s21, %s219_s21 }
   0xb   :  { %p226_p6 = por %p225_p5, %p224_p4 }
   0xd   :  { %p227_p7 = pnand %p226_p6, %p220_p3 }
   0xf   :  { %230 = shalt.err (!%p227_p7)
}
  0x10   :  { %s258_s22 = smov 128   ;;  %s259_s23 = smov 8  }
  0x11   :  { %21 = dma.hbm_to_vmem [thread:$0]  %s342_s0, 256, %s16_s13, [#allocation3], %s258_s22, %s258_s22, %s259_s23  }
  0x12   :  { %253 = dma.done.wait [#allocation3], 256  }
  0x13   :  { %254 = vsyncadd [#allocation3], 4294967040  ;;  %v260_v0 = vmov 0   ;;  %v130_v1 = vld [vmem:[%s343_s1] sm:$0xf]  ;;  %v305_v4 = vld [vmem:[#allocation2 + $0x8] sm:$0xff] }
  0x14   :  { %198 = vset.pattern.permute.xlu0 %v260_v0  ;;  %v140_v2 = vld [vmem:[%s344_s2] sm:$0xf]  ;;  %vm37_vm0 = vcmask 1043456   ;;  %v34_v7 = vcombine.high %v305_v4, %v305_v4  ;;  %v67_v8 = vmul.f32 %v305_v4, %v305_v4  ;;  %s261_s0 = smov [#allocation5]  }
  0x15   :  { %133 = vperm.xlu0 %198, %v130_v1   ;;  %v303_v3 = vld [vmem:[#allocation2] sm:$0xff]  ;;  %v52_v12 = vsel %vm37_vm0, %v305_v4, 0.0  ;;  %s181_s1 = sshll.u32 %s261_s0, 4  ;;  %s182_s1 = int_to_ptr.vmem [resolvable:$true] %s181_s1 }
  0x16   :  { %v33_v5 = vcombine.high %v303_v3, %v303_v3  ;;  %v66_v6 = vmul.f32 %v303_v3, %v303_v3  ;;  %v38_v9 = vsel %vm37_vm0, %v303_v3, 0.0  ;;  %v59_v14 = vsel %vm37_vm0, %v34_v7, 0.0  ;;  %s231_s2 = scalar_lea.vmem %s182_s1, 256  ;;  %p236_p9 = scmp.lt.s32.totalorder %s182_s1, %s182_s1 }
  0x17   :  { %v39_v13 = vrot.slane %v38_v9, 4  ;;  %v71_v15 = vcombine.high %v67_v8, %v67_v8  ;;  %v53_v18 = vrot.slane %v52_v12, 4  ;;  %v60_v20 = vrot.slane %v59_v14, 4  ;;  %p232_p8 = scmp.ne.s32.totalorder %s182_s1, %s231_s2  ;;  %p237_p10 = scmp.lt.s32.totalorder %s231_s2, %s231_s2 }
  0x18   :  { %v45_v10 = vsel %vm37_vm0, %v33_v5, 0.0  ;;  %v70_v11 = vcombine.high %v66_v6, %v66_v6  ;;  %v74_v17 = vsel %vm37_vm0, %v66_v6, 0.0  ;;  %v88_v21 = vsel %vm37_vm0, %v67_v8, 0.0 }
  0x19   :  { %147 = vperm.xlu0 %198, %v140_v2   ;;  %v46_v16 = vrot.slane %v45_v10, 4  ;;  %v40_v22 = vadd.f32 %v39_v13, %v38_v9  ;;  %v75_v23 = vrot.slane %v74_v17, 4  ;;  %v95_v24 = vsel %vm37_vm0, %v71_v15, 0.0  ;;  %p238_p11 = por %p237_p10, %p236_p9 }
  0x1a   :  { %v81_v19 = vsel %vm37_vm0, %v70_v11, 0.0  ;;  %v54_v27 = vadd.f32 %v53_v18, %v52_v12  ;;  %v89_v28 = vrot.slane %v88_v21, 4  ;;  %v61_v29 = vadd.f32 %v60_v20, %v59_v14 }
  0x1b   :  { %v47_v25 = vadd.f32 %v46_v16, %v45_v10  ;;  %v82_v26 = vrot.slane %v81_v19, 4  ;;  %v96_v30 = vrot.slane %v95_v24, 4  ;;  %v41_v31 = vrot.slane %v40_v22, 2  ;;  %p239_p12 = pnand %p238_p11, %p232_p8 }
  0x1c   :  { %v76_v32 = vadd.f32 %v75_v23, %v74_v17  ;;  %v55_v35 = vrot.slane %v54_v27, 2  ;;  %v90_v36 = vadd.f32 %v89_v28, %v88_v21  ;;  %v62_v37 = vrot.slane %v61_v29, 2 }
  0x1d   :  { %v48_v33 = vrot.slane %v47_v25, 2  ;;  %v83_v34 = vadd.f32 %v82_v26, %v81_v19  ;;  %v97_v38 = vadd.f32 %v96_v30, %v95_v24  ;;  %v42_v39 = vadd.f32 %v41_v31, %v40_v22 }
  0x1e   :  { %v77_v40 = vrot.slane %v76_v32, 2  ;;  %v56_v43 = vadd.f32 %v55_v35, %v54_v27  ;;  %v91_v44 = vrot.slane %v90_v36, 2  ;;  %v63_v45 = vadd.f32 %v62_v37, %v61_v29 }
  0x1f   :  { %v49_v41 = vadd.f32 %v48_v33, %v47_v25  ;;  %v84_v42 = vrot.slane %v83_v34, 2  ;;  %v98_v46 = vrot.slane %v97_v38, 2  ;;  %v43_v47 = vrot.slane %v42_v39, 1 }
  0x20   :  { %v78_v48 = vadd.f32 %v77_v40, %v76_v32  ;;  %v57_v51 = vrot.slane %v56_v43, 1  ;;  %v92_v52 = vadd.f32 %v91_v44, %v90_v36  ;;  %v64_v53 = vrot.slane %v63_v45, 1 }
  0x21   :  { %v50_v49 = vrot.slane %v49_v41, 1  ;;  %v85_v50 = vadd.f32 %v84_v42, %v83_v34  ;;  %v99_v54 = vadd.f32 %v98_v46, %v97_v38  ;;  %v44_v55 = vadd.f32 %v43_v47, %v42_v39 }
  0x22   :  { %v79_v56 = vrot.slane %v78_v48, 1  ;;  %v58_v59 = vadd.f32 %v57_v51, %v56_v43  ;;  %v93_v60 = vrot.slane %v92_v52, 1  ;;  %v65_v61 = vadd.f32 %v64_v53, %v63_v45 }
  0x23   :  { %v51_v57 = vadd.f32 %v50_v49, %v49_v41  ;;  %v86_v58 = vrot.slane %v85_v50, 1  ;;  %v100_v62 = vrot.slane %v99_v54, 1  ;;  %v102_v0 = vmul.f32 0.25, %v44_v55 }
  0x24   :  { %v80_v63 = vadd.f32 %v79_v56, %v78_v48  ;;  %v94_v5 = vadd.f32 %v93_v60, %v92_v52  ;;  %v104_v6 = vmul.f32 0.25, %v58_v59  ;;  %v105_v8 = vmul.f32 0.25, %v65_v61 }
  0x25   :  { %v87_v1 = vadd.f32 %v86_v58, %v85_v50  ;;  %v103_v2 = vmul.f32 0.25, %v51_v57  ;;  %v101_v7 = vadd.f32 %v100_v62, %v99_v54  ;;  %v110_v10 = vmul.f32 %v102_v0, %v102_v0 }
  0x26   :  { %v106_v9 = vmul.f32 0.25, %v80_v63  ;;  %v108_v13 = vmul.f32 0.25, %v94_v5  ;;  %v112_v14 = vmul.f32 %v104_v6, %v104_v6  ;;  %v113_v16 = vmul.f32 %v105_v8, %v105_v8 }
  0x27   :  { %v107_v11 = vmul.f32 0.25, %v87_v1  ;;  %v111_v12 = vmul.f32 %v103_v2, %v103_v2  ;;  %v109_v15 = vmul.f32 0.25, %v101_v7 }
  0x28   :  { %v114_v17 = vsub.f32 %v106_v9, %v110_v10  ;;  %v116_v19 = vsub.f32 %v108_v13, %v112_v14 }
  0x29   :  { %v115_v18 = vsub.f32 %v107_v11, %v111_v12  ;;  %v117_v20 = vsub.f32 %v109_v15, %v113_v16 }
  0x2a   :  { %v118_v21 = vmax.f32 %v114_v17, 0.0  ;;  %v120_v23 = vmax.f32 %v116_v19, 0.0 }
  0x2b   :  { %v119_v22 = vmax.f32 %v115_v18, 0.0  ;;  %v121_v24 = vmax.f32 %v117_v20, 0.0 }
  0x2c   :  { %v122_v25 = vadd.f32 1e-06, %v118_v21  ;;  %v124_v27 = vadd.f32 1e-06, %v120_v23 }
  0x2d   :  { %v123_v26 = vadd.f32 1e-06, %v119_v22  ;;  %v125_v28 = vadd.f32 1e-06, %v121_v24 }
  0x2e   :  { %201 = vrsqrt.f32 %v122_v25 }
  0x2f   :  { %203 = vrsqrt.f32 %v123_v26 }
  0x30   :  { %205 = vrsqrt.f32 %v124_v27 }
  0x31   :  { %207 = vrsqrt.f32 %v125_v28 }
  0x38   :  { %v202_v29 = vpop.eup %201 }
  0x39   :  { %v204_v30 = vpop.eup %203 }
  0x3a   :  { %v206_v31 = vpop.eup %205 }
  0x3b   :  { %v208_v32 = vpop.eup %207 }
  0x94   :  { %v134_v33 = vpop.permute.xlu0 %133 }
  0x95   :  { %v136_v34 = vmul.f32 %v202_v29, %v134_v33  ;;  %v137_v35 = vmul.f32 %v204_v30, %v134_v33  ;;  %v138_v36 = vmul.f32 %v206_v31, %v134_v33  ;;  %v139_v37 = vmul.f32 %v208_v32, %v134_v33 }
  0x97   :  { %v158_v38 = vcombine.low %v136_v34, %v137_v35  ;;  %v141_v39 = vmul.f32 %v136_v34, %v102_v0  ;;  %v142_v40 = vmul.f32 %v137_v35, %v103_v2  ;;  %v159_v41 = vcombine.low %v138_v36, %v139_v37 }
  0x98   :  { %v148_v42 = vpop.permute.xlu0 %147  ;;  %v143_v43 = vmul.f32 %v138_v36, %v104_v6  ;;  %v144_v44 = vmul.f32 %v139_v37, %v105_v8 }
  0x99   :  { %v150_v45 = vsub.f32 %v148_v42, %v141_v39  ;;  %v151_v46 = vsub.f32 %v148_v42, %v142_v40  ;;  %v162_v50 = vmul.f32 %v158_v38, %v303_v3  ;;  %v163_v52 = vmul.f32 %v159_v41, %v305_v4 }
  0x9a   :  { %v152_v47 = vsub.f32 %v148_v42, %v143_v43  ;;  %v153_v48 = vsub.f32 %v148_v42, %v144_v44 }
  0x9b   :  { %v168_v49 = vcombine.low %v150_v45, %v151_v46 }
  0x9c   :  { %v169_v51 = vcombine.low %v152_v47, %v153_v48 }
  0x9d   :  { %v172_v53 = vadd.f32 %v168_v49, %v162_v50 }
  0x9e   :  { %v173_v54 = vadd.f32 %v169_v51, %v163_v52 }
  0x9f   :  { %174 = vst [vmem:[#allocation5] sm:$0xff] %v172_v53 }
  0xa0   :  { %175 = vst [vmem:[#allocation5 + $0x8] sm:$0xff] %v173_v54 }
  0xa1   :  { %242 = shalt.err (!%p239_p12)
}
  0xa2   :  { %s243_s5 = scalar_lea.hbm %s345_s3, 256 }
  0xa3   :  { %p244_p13 = scmp.ne.s32.totalorder %s345_s3, %s243_s5  ;;  %p247_p0 = scmp.lt.u32.totalorder %s243_s5, %s345_s3 }
  0xa5   :  { %p249_p1 = pnand %p247_p0, %p244_p13 }
  0xa7   :  { %252 = shalt.err (!%p249_p1)
}
  0xa8   :  { %187 = dma.vmem_to_hbm [thread:$0]  %s182_s1, 256, %s345_s3, [#allocation4], %s258_s22, %s258_s22, %s259_s23  }
  0xa9   :  { %255 = dma.done.wait [#allocation4], 256  }
  0xaa   :  { %256 = vsyncadd [#allocation4], 4294967040 }
  0xab   :  { %191 = vsyncpa [#allocation3], 1 }
  0xac   :  { %192 = vsyncpa [#allocation4], 1 }

</bundles_post_ra>
